<compile_context>
chip_gen: v6e
topology: v6e:2x2x1
jax: 0.10.0
libtpu: 0.0.40
codegen_flags: <defaults>
</compile_context>

<pallas_src>
import functools

import jax
import jax.numpy as jnp
from jax.experimental import pallas as pl
from jax.experimental.pallas import tpu as pltpu

# Rows per grid step for the row-sum kernel.  Per-step overhead is ~0.35 us, so
# tiles must be large; 1024 rows x D=32 x f32 = 128 KiB per (double-buffered)
# input block — trivially inside the scoped-VMEM default on v5e/v6e and on
# v7x's smaller 32 MiB scoped / 64 MiB physical VMEM.
_ROW_TILE = 1024


def _rowsum_kernel(x_ref, o_ref):
    # x_ref: (TN, D) tile with D (full extent) on the lane axis.
    # Accumulate in f32 even if the table is ever stored in bf16.
    o_ref[...] = jnp.sum(x_ref[...].astype(jnp.float32), axis=1, keepdims=True)


def rowsum(table, row_tile=_ROW_TILE):
    """Row-sums of a (N, D) table via a tiled Pallas reduction. Returns (N,) f32.

    Output block is (TN, 1); its writeback is D× smaller than the input reads,
    so the kernel stays HBM-read-bound (the lane-dense-output lever only
    matters when output bytes are comparable to input bytes).
    """
    n, d = table.shape
    if n >= row_tile:
        tn = row_tile
    else:
        tn = ((n + 7) // 8) * 8          # small table: one sublane-aligned tile
    n_pad = ((n + tn - 1) // tn) * tn
    if n_pad != n:
        # zero rows -> zero sums, discarded below; at most one extra tile.
        table = jnp.pad(table, ((0, n_pad - n), (0, 0)))

    out = pl.pallas_call(
        _rowsum_kernel,
        out_shape=jax.ShapeDtypeStruct((n_pad, 1), jnp.float32),
        grid_spec=pltpu.PrefetchScalarGridSpec(
            num_scalar_prefetch=0,
            grid=(n_pad // tn,),
            in_specs=[pl.BlockSpec((tn, d), lambda i: (i, 0))],
            out_specs=pl.BlockSpec((tn, 1), lambda i: (i, 0)),
        ),
        compiler_params=pltpu.CompilerParams(
            dimension_semantics=("parallel",),  # shard row tiles across TCs (v7x)
        ),
    )(table)
    return out[:n, 0]


@functools.partial(jax.jit, static_argnames=("score_dim",))
def ar_layer_forward(ent_emb, rel_emb, edges_per_etype, *, score_dim):
    """edges_per_etype: tuple of (src_ids, dst_ids, rel_edge_ids) int32 arrays."""
    # Hot path: one HBM pass over each embedding table (Pallas).
    ent_sum = rowsum(ent_emb)            # (num_entities,)
    rel_sum = rowsum(rel_emb)            # (num_rel_edge_ids,)

    # Fused per-edge scoring across ALL edge types: three 1-D gathers + 2 adds.
    # TODO(synk): there is no efficient vectorized dynamic-gather primitive
    # inside a Pallas TPU kernel, so this O(E)-byte glue stays in XLA
    # (negligible traffic after the row-sum rewrite).
    src_all = jnp.concatenate([e[0] for e in edges_per_etype])
    dst_all = jnp.concatenate([e[1] for e in edges_per_etype])
    rid_all = jnp.concatenate([e[2] for e in edges_per_etype])
    scores_all = (jnp.take(ent_sum, src_all)
                  + jnp.take(rel_sum, rid_all)
                  - jnp.take(ent_sum, dst_all))

    # Per-edge-type zero padding on the cheap 1-D scores (matches torch.cat
    # with zeros when an edge type has fewer edges than score_dim).
    parts = []
    off = 0
    for src, _, _ in edges_per_etype:
        e = src.shape[0]
        s = scores_all[off:off + e]      # static offsets under jit
        off += e
        if e < score_dim:
            s = jnp.concatenate([s, jnp.zeros(score_dim - e, s.dtype)])
        parts.append(s)
    return jnp.concatenate(parts)


if __name__ == "__main__":
    key = jax.random.PRNGKey(0)
    k_ent, k_rel, k_e1, k_e2 = jax.random.split(key, 4)

    num_ents, num_rel_edge_ids, emb_dim = 20, 16, 32
    score_dim = 12

    # deterministic synthetic nn.Embedding weights
    ent_emb = jax.random.normal(k_ent, (num_ents, emb_dim), dtype=jnp.float32)
    rel_emb = jax.random.normal(k_rel, (num_rel_edge_ids, emb_dim), dtype=jnp.float32)

    def make_edges(k, n_edges):
        ks, kd, kr = jax.random.split(k, 3)
        src = jax.random.randint(ks, (n_edges,), 0, num_ents, dtype=jnp.int32)
        dst = jax.random.randint(kd, (n_edges,), 0, num_ents, dtype=jnp.int32)
        rid = jax.random.randint(kr, (n_edges,), 0, num_rel_edge_ids, dtype=jnp.int32)
        return src, dst, rid

    # one edge type shorter than score_dim (gets zero-padded), one longer.
    edges_per_etype = (make_edges(k_e1, 7), make_edges(k_e2, 18))

    out = ar_layer_forward(ent_emb, rel_emb, edges_per_etype, score_dim=score_dim)
    out = jax.block_until_ready(out)

    # pure-JAX reference (mirrors the PyTorch ARLayer forward)
    ref_parts = []
    for src, dst, rid in edges_per_etype:
        s = jnp.sum(ent_emb[src] + rel_emb[rid] - ent_emb[dst], axis=1)
        if s.shape[0] < score_dim:
            s = jnp.concatenate([s, jnp.zeros(score_dim - s.shape[0], jnp.float32)])
        ref_parts.append(s)
    ref = jnp.concatenate(ref_parts)

    assert out.shape == ref.shape, (out.shape, ref.shape)
    assert jnp.allclose(out, ref, atol=1e-4, rtol=1e-4), float(
        jnp.max(jnp.abs(out - ref)))

    print("KERNEL_OK")
</pallas_src>

<mosaic_0001>
module attributes {stable_mosaic.version = 11 : i64} {
  func.func @_rowsum_kernel(%arg0: i32, %arg1: memref<16x32xf32, #tpu.memory_space<vmem>>, %arg2: memref<16x1xf32, #tpu.memory_space<vmem>>) attributes {dimension_semantics = [#tpu.dimension_semantics<parallel>], iteration_bounds = array<i64: 1>, scalar_prefetch = 0 : i64, scratch_operands = 0 : i64, tpu.core_type = #tpu.core_type<tc>, window_params = [{transform_indices = @transform_0, window_bounds = array<i64: 16, 32>}, {transform_indices = @transform_1, window_bounds = array<i64: 16, 1>}]} {
    %c0 = arith.constant 0 : index
    %c0_0 = arith.constant 0 : index
    %0 = vector.load %arg1[%c0, %c0_0] : memref<16x32xf32, #tpu.memory_space<vmem>>, vector<16x32xf32>
    %cst = arith.constant dense<0.000000e+00> : vector<16xf32>
    %1 = vector.multi_reduction <add>, %0, %cst [1] : vector<16x32xf32> to vector<16xf32>
    %2 = vector.shape_cast %1 : vector<16xf32> to vector<16x1xf32>
    %c0_1 = arith.constant 0 : index
    %c0_2 = arith.constant 0 : index
    %3 = vector.load %arg2[%c0_1, %c0_2] : memref<16x1xf32, #tpu.memory_space<vmem>>, vector<16x1xf32>
    tpu.vector_store %arg2[%c0_1, %c0_2], %2 {strides = array<i32>} : memref<16x1xf32, #tpu.memory_space<vmem>>, vector<16x1xf32>,
    return
  }
  func.func @transform_0(%arg0: i32) -> (i32, i32) {
    %c0_i32 = arith.constant 0 : i32
    %c0_i32_0 = arith.constant 0 : i32
    return %arg0, %c0_i32 : i32, i32
  }
  func.func @transform_1(%arg0: i32) -> (i32, i32) {
    %c0_i32 = arith.constant 0 : i32
    %c0_i32_0 = arith.constant 0 : i32
    return %arg0, %c0_i32 : i32, i32
  }
}

module attributes {stable_mosaic.version = 11 : i64} {
  func.func @_rowsum_kernel(%arg0: i32, %arg1: memref<24x32xf32, #tpu.memory_space<vmem>>, %arg2: memref<24x1xf32, #tpu.memory_space<vmem>>) attributes {dimension_semantics = [#tpu.dimension_semantics<parallel>], iteration_bounds = array<i64: 1>, scalar_prefetch = 0 : i64, scratch_operands = 0 : i64, tpu.core_type = #tpu.core_type<tc>, window_params = [{transform_indices = @transform_0, window_bounds = array<i64: 24, 32>}, {transform_indices = @transform_1, window_bounds = array<i64: 24, 1>}]} {
    %c0 = arith.constant 0 : index
    %c0_0 = arith.constant 0 : index
    %0 = vector.load %arg1[%c0, %c0_0] : memref<24x32xf32, #tpu.memory_space<vmem>>, vector<24x32xf32>
    %cst = arith.constant dense<0.000000e+00> : vector<24xf32>
    %1 = vector.multi_reduction <add>, %0, %cst [1] : vector<24x32xf32> to vector<24xf32>
    %2 = vector.shape_cast %1 : vector<24xf32> to vector<24x1xf32>
    %c0_1 = arith.constant 0 : index
    %c0_2 = arith.constant 0 : index
    %3 = vector.load %arg2[%c0_1, %c0_2] : memref<24x1xf32, #tpu.memory_space<vmem>>, vector<24x1xf32>
    tpu.vector_store %arg2[%c0_1, %c0_2], %2 {strides = array<i32>} : memref<24x1xf32, #tpu.memory_space<vmem>>, vector<24x1xf32>,
    return
  }
  func.func @transform_0(%arg0: i32) -> (i32, i32) {
    %c0_i32 = arith.constant 0 : i32
    %c0_i32_0 = arith.constant 0 : i32
    return %arg0, %c0_i32 : i32, i32
  }
  func.func @transform_1(%arg0: i32) -> (i32, i32) {
    %c0_i32 = arith.constant 0 : i32
    %c0_i32_0 = arith.constant 0 : i32
    return %arg0, %c0_i32 : i32, i32
  }
}

</mosaic_0001>

<bundles_post_ra>
// kernel: ar_layer_forward.3
= control target key start
LH: loop header
LB: loop body
LE: loop exit
PB: predicated region body
PF: predicated region fallthrough
CT: control target
= control target key end

     0   :  { %6 = vsyncpa [#allocation3], 0  ;;  %s64_s6 = smov [#allocation2]   ;;  %s86_s0 = inlined_call_operand.hbm [shape: f32[16,32], index: 0, kind: input, shape index: {}]   ;;  %s87_s1 = inlined_call_operand.vmem [shape: f32[16,1], index: 1, kind: output, shape index: {}]  }
   0x1   :  { %s12_s7 = sshll.u32 %s64_s6, 4  ;;  %s13_s7 = int_to_ptr.vmem [resolvable:$true] %s12_s7 }
   0x2   :  { %s50_s8 = scalar_lea.vmem %s13_s7, 256  ;;  %p55_p1 = scmp.lt.s32.totalorder %s13_s7, %s13_s7 }
   0x3   :  { %p51_p0 = scmp.ne.s32.totalorder %s13_s7, %s50_s8  ;;  %p56_p2 = scmp.lt.s32.totalorder %s50_s8, %s50_s8 }
   0x5   :  { %p57_p3 = por %p56_p2, %p55_p1 }
   0x7   :  { %p58_p4 = pnand %p57_p3, %p51_p0 }
   0x9   :  { %61 = shalt.err (!%p58_p4)
}
   0xa   :  { %s65_s9 = smov 128   ;;  %s66_s10 = smov 8  }
   0xb   :  { %18 = dma.hbm_to_vmem [thread:$0]  %s86_s0, 256, %s13_s7, [#allocation3], %s65_s9, %s65_s9, %s66_s10  }
   0xc   :  { %62 = dma.done.wait [#allocation3], 256  }
   0xd   :  { %63 = vsyncadd [#allocation3], 4294967040  ;;  %vm24_vm0 = vcmask 261120   ;;  %v22_v0 = vld [vmem:[#allocation2] sm:$0xff]  ;;  %v23_v1 = vld [vmem:[#allocation2 + $0x8] sm:$0xff]  ;;  %vm31_vm1 = vcmask 7168  }
   0xe   :  { %v25_v2 = vsel %vm24_vm0, %v22_v0, 0.0  ;;  %v28_v3 = vsel %vm24_vm0, %v23_v1, 0.0 }
   0xf   :  { %26 = vadd.xlane.f32.xlu0 %v25_v2 }
  0x13   :  { %29 = vadd.xlane.f32.xlu0 %v28_v3 }
  0x98   :  { %v27_v4 = vpop.xlane.xlu0 %26 }
  0x99   :  { %32 = vst.msk [vmem:[%s87_s1] sm:$0xff] %vm31_vm1, %v27_v4 }
  0x9c   :  { %v30_v5 = vpop.xlane.xlu0 %29 }
  0x9d   :  { %33 = vst.msk [vmem:[%s87_s1 + $0x8] sm:$0xff] %vm31_vm1, %v30_v5 }
  0x9e   :  { %38 = vsyncpa [#allocation3], 1 }

// kernel: ar_layer_forward.2
= control target key start
LH: loop header
LB: loop body
LE: loop exit
PB: predicated region body
PF: predicated region fallthrough
CT: control target
= control target key end

     0   :  { %vm11_vm0 = vcmask 261120   ;;  %vm21_vm1 = vcmask 7168   ;;  %s57_s0 = inlined_call_operand.vmem [shape: f32[24,32], index: 0, kind: input, shape index: {}]   ;;  %s58_s1 = inlined_call_operand.vmem [shape: f32[24,1], index: 1, kind: output, shape index: {}]  }
   0x1   :  { %v8_v0 = vld [vmem:[%s57_s0] sm:$0xff]  ;;  %v10_v1 = vld [vmem:[%s57_s0 + $0x10] sm:$0xff]  ;;  %v9_v2 = vld [vmem:[%s57_s0 + $0x8] sm:$0xff] }
   0x2   :  { %v12_v3 = vsel %vm11_vm0, %v8_v0, 0.0  ;;  %v18_v4 = vsel %vm11_vm0, %v10_v1, 0.0  ;;  %v15_v5 = vsel %vm11_vm0, %v9_v2, 0.0 }
   0x3   :  { %13 = vadd.xlane.f32.xlu0 %v12_v3  ;;  %19 = vadd.xlane.f32.xlu1 %v18_v4 }
   0x7   :  { %16 = vadd.xlane.f32.xlu0 %v15_v5 }
  0x8c   :  { %v14_v6 = vpop.xlane.xlu0 %13  ;;  %v20_v7 = vpop.xlane.xlu1 %19 }
  0x8d   :  { %22 = vst.msk [vmem:[%s58_s1] sm:$0xff] %vm21_vm1, %v14_v6  ;;  %24 = vst.msk [vmem:[%s58_s1 + $0x10] sm:$0xff] %vm21_vm1, %v20_v7 }
  0x90   :  { %v17_v8 = vpop.xlane.xlu0 %16 }
  0x91   :  { %23 = vst.msk [vmem:[%s58_s1 + $0x8] sm:$0xff] %vm21_vm1, %v17_v8 }

</bundles_post_ra>
